<compile_context>
chip_gen: v7x
topology: tpu7x:2x2x1
jax: 0.10.0
libtpu: 0.0.40
codegen_flags: <defaults>
</compile_context>

<pallas_src>
import functools

import jax
import jax.numpy as jnp
from jax.experimental import pallas as pl
from jax.experimental.pallas import tpu as pltpu

_LANE = 128


def _round_down(a, b):
    return (a // b) * b


# ----------------------------- Pallas kernel ------------------------------ #
def _fused_up_out_kernel(w_ref, x_ref, b_ref, o_ref):
    # w_ref : (4*O, C)    folded (ConvTranspose2x2 . 1x1-conv) weights
    # x_ref : (C, TILE)   pixel tile: channels on sublanes, pixels on lanes
    # b_ref : (4*O, 1)    folded bias (f32)
    # o_ref : (4*O, TILE) 4 sub-pixel outputs x O channels per input pixel
    x = x_ref[...].astype(w_ref.dtype)   # in-register cast: no extra HBM pass
    acc = jnp.dot(w_ref[...], x, preferred_element_type=jnp.float32)
    o_ref[...] = (acc + b_ref[...]).astype(o_ref.dtype)


def _choose_tile(hw, c, p, in_bytes, out_bytes, tm, n_batch, budget_bytes):
    """Largest legal pixel tile: multiple of 128 (or the full HW), VMEM-capped."""
    tile = min(tm, hw)
    if tile < hw:                                  # partial tiles must be lane-aligned
        tile = max(_LANE, _round_down(tile, _LANE))

    def need(t):                                   # double-buffered in/out tiles
        return 2 * c * t * in_bytes + 2 * p * t * out_bytes

    while tile > _LANE and need(tile) > budget_bytes:
        tile = max(_LANE, _round_down(tile // 2, _LANE))

    # Keep >= 2 grid steps when cheap (pipeline overlap; v7x 2nd TensorCore).
    steps = n_batch * (-(-hw // tile))
    if steps < 2 and hw >= 2 * _LANE:
        half = -(-hw // 2)
        tile = max(_LANE, ((half + _LANE - 1) // _LANE) * _LANE)
    return tile


@functools.partial(jax.jit, static_argnames=("tm", "out_dtype"))
def fused_up_out(x_nchw, w_fused, b_fused, *, tm=8192, out_dtype=None):
    """Fused ConvTranspose2d(C, C//2, 2, 2) -> Conv2d(C//2, O, 1), NCHW in/out.

    w_fused: (4*O, C) folded weights (compute dtype); b_fused: (4*O, 1) f32.
    Compute dtype == w_fused.dtype (x is cast in-kernel); output dtype defaults
    to the compute dtype.
    """
    assert tm >= _LANE and tm % _LANE == 0
    N, C, H, W = x_nchw.shape
    P = w_fused.shape[0]
    O = P // 4
    HW = H * W
    if out_dtype is None:
        out_dtype = w_fused.dtype

    in_bytes = jnp.dtype(x_nchw.dtype).itemsize
    out_bytes = jnp.dtype(out_dtype).itemsize
    tile = _choose_tile(HW, C, P, in_bytes, out_bytes, tm, N,
                        budget_bytes=28 * 1024 * 1024)
    n_tiles = -(-HW // tile)

    # Free reshape (merges contiguous trailing dims); x stays in its original
    # dtype -> a single HBM read, cast happens in-kernel.
    x3d = x_nchw.reshape(N, C, HW)

    vmem_need = (2 * C * tile * in_bytes + 2 * P * tile * out_bytes
                 + 2 * P * C * jnp.dtype(w_fused.dtype).itemsize
                 + 4 * P + (1 << 20))
    vmem_limit = int(min(48 * 1024 * 1024, max(24 * 1024 * 1024, 2 * vmem_need)))

    out3d = pl.pallas_call(
        _fused_up_out_kernel,
        out_shape=jax.ShapeDtypeStruct((N, P, HW), out_dtype),
        grid_spec=pltpu.PrefetchScalarGridSpec(
            num_scalar_prefetch=0,
            grid=(N, n_tiles),
            in_specs=[
                pl.BlockSpec((P, C), lambda n, i: (0, 0)),              # weights (resident)
                pl.BlockSpec((None, C, tile), lambda n, i: (n, 0, i)),  # x pixel tile
                pl.BlockSpec((P, 1), lambda n, i: (0, 0)),              # bias (resident)
            ],
            out_specs=pl.BlockSpec((None, P, tile), lambda n, i: (n, 0, i)),
        ),
        compiler_params=pltpu.CompilerParams(
            dimension_semantics=("parallel", "parallel"),
            vmem_limit_bytes=vmem_limit),
    )(w_fused, x3d, b_fused)

    # Sub-pixel scatter of the 4 outputs per pixel into the 2x-upsampled map
    # (layout glue, done in out_dtype; see TODO at top about in-kernel scatter).
    y = out3d.reshape(N, 2, 2, O, H, W)
    y = jnp.transpose(y, (0, 3, 4, 1, 5, 2)).reshape(N, O, 2 * H, 2 * W)
    return y


# ------------------------------ weight fold -------------------------------- #
def fold_up_out_weights(up_w, up_b, out_w, out_b):
    """Fold ConvTranspose2d(C, M, 2, 2)+bias and Conv2d(M, O, 1)+bias into one
    (4*O, C) matrix and (4*O, 1) bias.  Row order is (i, j, o) for output pixel
    (2h+i, 2w+j), channel o."""
    C = up_w.shape[0]
    O = out_w.shape[0]
    w = jnp.einsum("cmij,om->ijoc", up_w, out_w).reshape(4 * O, C)
    b = jnp.tile(out_w @ up_b + out_b, 4).reshape(4 * O, 1)
    return w.astype(jnp.float32), b.astype(jnp.float32)


# ------------------------- pure-JAX reference ------------------------------ #
def _ref_branch(x, up_w, up_b, out_w, out_b):
    N, C, H, W = x.shape
    O = out_w.shape[0]
    t = jnp.einsum("nchw,cmij->nhwijm", x, up_w) + up_b          # (N,H,W,2,2,C//2)
    z = jnp.einsum("nhwijm,om->nhwijo", t, out_w) + out_b        # (N,H,W,2,2,O)
    z = jnp.transpose(z, (0, 1, 3, 2, 4, 5)).reshape(N, 2 * H, 2 * W, O)
    return jnp.transpose(z, (0, 3, 1, 2))                        # NCHW


# ------------------------------- module ------------------------------------ #
class SegDeep:
    """JAX/Pallas port of Seg_Deep."""

    def __init__(self, key, out_channels=4, dims=(384, 192, 96, 4)):
        self.out_channels = out_channels
        self.dims = dims
        k = jax.random.split(key, 8)

        def init(kk, shape, fan_in):
            return jax.random.normal(kk, shape, jnp.float32) / jnp.sqrt(fan_in)

        c1, c2 = dims[1], dims[2]
        # Up_Basic(dim) ~ ConvTranspose2d(dim, dim//2, 2, 2)
        self.up1_w = init(k[0], (c1, c1 // 2, 2, 2), c1 * 4)
        self.up1_b = init(k[1], (c1 // 2,), c1 * 4)
        self.out1_w = init(k[2], (out_channels, c1 // 2), c1 // 2)
        self.out1_b = init(k[3], (out_channels,), c1 // 2)
        self.up2_w = init(k[4], (c2, c2 // 2, 2, 2), c2 * 4)
        self.up2_b = init(k[5], (c2 // 2,), c2 * 4)
        self.out2_w = init(k[6], (out_channels, c2 // 2), c2 // 2)
        self.out2_b = init(k[7], (out_channels,), c2 // 2)

        # Weight fold hoisted to init (done once); per-dtype casts cached.
        self.w1_f, self.b1_f = fold_up_out_weights(self.up1_w, self.up1_b,
                                                   self.out1_w, self.out1_b)
        self.w2_f, self.b2_f = fold_up_out_weights(self.up2_w, self.up2_b,
                                                   self.out2_w, self.out2_b)
        self._wcache = {}

    def _fused_params(self, branch, dtype):
        key = (branch, jnp.dtype(dtype).name)
        if key not in self._wcache:
            w, b = (self.w1_f, self.b1_f) if branch == 1 else (self.w2_f, self.b2_f)
            self._wcache[key] = (w.astype(dtype), b)
        return self._wcache[key]

    def __call__(self, x, compute_dtype=jnp.bfloat16):
        # TODO(synk): the two branch pallas_calls could be merged under one jit
        #             to save a dispatch; kept separate for clarity.
        _, x1, x2, x3 = x
        w1, b1 = self._fused_params(1, compute_dtype)
        w2, b2 = self._fused_params(2, compute_dtype)
        y1 = fused_up_out(x1, w1, b1)
        y2 = fused_up_out(x2, w2, b2)
        return [y1, y2, x3]

    def reference(self, x):
        _, x1, x2, x3 = x
        y1 = _ref_branch(x1, self.up1_w, self.up1_b, self.out1_w, self.out1_b)
        y2 = _ref_branch(x2, self.up2_w, self.up2_b, self.out2_w, self.out2_b)
        return [y1, y2, x3]


# --------------------------------- main ------------------------------------ #
if __name__ == "__main__":
    key = jax.random.PRNGKey(0)
    k0, k1, k2, k3, kp = jax.random.split(key, 5)

    out_channels = 4
    dims = (64, 32, 16, 4)  # small analogue of (384, 192, 96, 4)

    # Multi-scale feature pyramid (NCHW), deepest first.
    x0 = jax.random.normal(k0, (2, dims[0], 4, 4), jnp.float32)    # unused
    x1 = jax.random.normal(k1, (2, dims[1], 8, 8), jnp.float32)
    x2 = jax.random.normal(k2, (2, dims[2], 16, 16), jnp.float32)
    x3 = jax.random.normal(k3, (2, dims[3], 32, 32), jnp.float32)  # passthrough
    x = [x0, x1, x2, x3]

    model = SegDeep(kp, out_channels=out_channels, dims=dims)

    # Optimized bf16 path: bf16 folded weights, in-kernel x cast, bf16 output.
    out = model(x)
    out = [jax.block_until_ready(o) for o in out]
    ref = model.reference(x)

    assert out[0].shape == (2, out_channels, 16, 16)
    assert out[1].shape == (2, out_channels, 32, 32)
    assert out[2].shape == x3.shape
    assert out[0].dtype == jnp.bfloat16 and out[1].dtype == jnp.bfloat16

    # bf16 weights/compute/output with f32 accumulation -> loose tolerance.
    for a, b in zip(out[:2], ref[:2]):
        assert jnp.allclose(a.astype(jnp.float32), b, rtol=3e-2, atol=3e-2), \
            "bf16 path mismatch vs reference"
    assert jnp.array_equal(out[2], ref[2])

    # Exact check of the weight fold / tiling with f32 weights and f32 output.
    y1 = jax.block_until_ready(fused_up_out(x1, model.w1_f, model.b1_f))
    y2 = jax.block_until_ready(fused_up_out(x2, model.w2_f, model.b2_f))
    assert y1.dtype == jnp.float32 and y2.dtype == jnp.float32
    assert jnp.allclose(y1, ref[0], rtol=1e-4, atol=1e-4), "f32 path mismatch vs reference"
    assert jnp.allclose(y2, ref[1], rtol=1e-4, atol=1e-4), "f32 path mismatch vs reference"

    # Ragged pixel count: HW = 192 with tm=128 forces a partial (64-lane) last
    # block, exercising Pallas boundary masking instead of jnp.pad.
    xr = jax.random.normal(k1, (1, dims[1], 8, 24), jnp.float32)
    w1b, b1b = model._fused_params(1, jnp.bfloat16)
    yr = jax.block_until_ready(fused_up_out(xr, w1b, b1b, tm=128))
    rr = _ref_branch(xr, model.up1_w, model.up1_b, model.out1_w, model.out1_b)
    assert yr.shape == rr.shape
    assert jnp.allclose(yr.astype(jnp.float32), rr, rtol=3e-2, atol=3e-2), \
        "ragged/partial-block path mismatch vs reference"

    print("KERNEL_OK")
</pallas_src>

<mosaic_0001>
module attributes {stable_mosaic.version = 11 : i64} {
  func.func @_fused_up_out_kernel(%arg0: i32, %arg1: i32, %arg2: memref<16x32xbf16, #tpu.memory_space<vmem>>, %arg3: memref<1x32x64xf32, #tpu.memory_space<vmem>>, %arg4: memref<16x1xf32, #tpu.memory_space<vmem>>, %arg5: memref<1x16x64xbf16, #tpu.memory_space<vmem>>) attributes {dimension_semantics = [#tpu.dimension_semantics<parallel>, #tpu.dimension_semantics<parallel>], iteration_bounds = array<i64: 2, 1>, scalar_prefetch = 0 : i64, scratch_operands = 0 : i64, tpu.core_type = #tpu.core_type<tc>, window_params = [{pipeline_mode = #tpu.pipeline_mode<synchronous>, transform_indices = @transform_0, window_bounds = array<i64: 16, 32>}, {transform_indices = @transform_1, window_bounds = array<i64: 1, 32, 64>}, {pipeline_mode = #tpu.pipeline_mode<synchronous>, transform_indices = @transform_2, window_bounds = array<i64: 16, 1>}, {transform_indices = @transform_3, window_bounds = array<i64: 1, 16, 64>}]} {
    %c0 = arith.constant 0 : index
    %c0_0 = arith.constant 0 : index
    %c0_1 = arith.constant 0 : index
    %0 = vector.load %arg3[%c0, %c0_0, %c0_1] : memref<1x32x64xf32, #tpu.memory_space<vmem>>, vector<1x32x64xf32>
    %1 = vector.shape_cast %0 : vector<1x32x64xf32> to vector<32x64xf32>
    %2 = arith.truncf %1 : vector<32x64xf32> to vector<32x64xbf16>
    %c0_2 = arith.constant 0 : index
    %c0_3 = arith.constant 0 : index
    %3 = vector.load %arg2[%c0_2, %c0_3] : memref<16x32xbf16, #tpu.memory_space<vmem>>, vector<16x32xbf16>
    %cst = arith.constant dense<0.000000e+00> : vector<16x64xf32>
    %4 = tpu.matmul %3, %2, %cst {dimension_numbers = #tpu.dot_dimension_numbers<[1], [0], [0], [1], [0, 0, 1, 1], [], []>} : vector<16x32xbf16>, vector<32x64xbf16>, vector<16x64xf32> -> vector<16x64xf32>
    %c0_4 = arith.constant 0 : index
    %c0_5 = arith.constant 0 : index
    %5 = vector.load %arg4[%c0_4, %c0_5] : memref<16x1xf32, #tpu.memory_space<vmem>>, vector<16x1xf32>
    %6 = vector.broadcast %5 : vector<16x1xf32> to vector<16x64xf32>
    %7 = arith.addf %4, %6 : vector<16x64xf32>
    %8 = arith.truncf %7 : vector<16x64xf32> to vector<16x64xbf16>
    %c0_6 = arith.constant 0 : index
    %c0_7 = arith.constant 0 : index
    %c0_8 = arith.constant 0 : index
    %9 = vector.load %arg5[%c0_6, %c0_7, %c0_8] : memref<1x16x64xbf16, #tpu.memory_space<vmem>>, vector<1x16x64xbf16>
    %10 = vector.shape_cast %9 : vector<1x16x64xbf16> to vector<16x64xbf16>
    %11 = vector.shape_cast %8 : vector<16x64xbf16> to vector<1x16x64xbf16>
    tpu.vector_store %arg5[%c0_6, %c0_7, %c0_8], %11 {strides = array<i32>} : memref<1x16x64xbf16, #tpu.memory_space<vmem>>, vector<1x16x64xbf16>,
    return
  }
  func.func @transform_0(%arg0: i32, %arg1: i32) -> (i32, i32) {
    %c0_i32 = arith.constant 0 : i32
    %c0_i32_0 = arith.constant 0 : i32
    %c0_i32_1 = arith.constant 0 : i32
    return %c0_i32, %c0_i32_0 : i32, i32
  }
  func.func @transform_1(%arg0: i32, %arg1: i32) -> (i32, i32, i32) {
    %c0_i32 = arith.constant 0 : i32
    %c0_i32_0 = arith.constant 0 : i32
    return %arg0, %c0_i32, %arg1 : i32, i32, i32
  }
  func.func @transform_2(%arg0: i32, %arg1: i32) -> (i32, i32) {
    %c0_i32 = arith.constant 0 : i32
    %c0_i32_0 = arith.constant 0 : i32
    %c0_i32_1 = arith.constant 0 : i32
    return %c0_i32, %c0_i32_0 : i32, i32
  }
  func.func @transform_3(%arg0: i32, %arg1: i32) -> (i32, i32, i32) {
    %c0_i32 = arith.constant 0 : i32
    %c0_i32_0 = arith.constant 0 : i32
    return %arg0, %c0_i32, %arg1 : i32, i32, i32
  }
}

</mosaic_0001>

<bundles_post_ra>
// kernel: fused_up_out.1
= control target key start
LH: loop header
LB: loop body
LE: loop exit
PB: predicated region body
PF: predicated region fallthrough
CT: control target
= control target key end

     0   :  { %s473_s12 = smov 0   ;;  %s475_s13 = smov 0   ;;  %s515_s0 = inlined_call_operand.vmem [shape: bf16[16,32], index: 0, kind: input, shape index: {}]   ;;  %s516_s1 = inlined_call_operand.vmem [shape: f32[2,32,64], index: 1, kind: input, shape index: {}]   ;;  %s517_s2 = inlined_call_operand.vmem [shape: f32[16,1], index: 2, kind: input, shape index: {}]   ;;  %s518_s3 = inlined_call_operand.vmem [shape: bf16[2,16,64], index: 3, kind: output, shape index: {}]  }
   0x1   :  { %s477_s14 = smov 0  }
   0x2 LB: > { %s25_s15 = sadd.s32 1, %s444_s13  ;;  %p371_p0 = scmp.ge.s32.totalorder %s448_s14, 1  ;;  %s448_s14 = sphi %s477_s14, %s13_s14   ;;  %s444_s13 = sphi %s475_s13, %s520_s13   ;;  %s440_s12 = sphi %s473_s12, %s519_s12  }
   0x3   : > { %p27_p1 = scmp.ge.s32.totalorder %s25_s15, 2  ;;  %p156_p2 = scmp.lt.s32.totalorder %s448_s14, 3 }
   0x5   : > { %s522_s15 = smov (%p27_p1, %s25_s15), 0  ;;  %p157_p3 = pnand %p371_p0, %p156_p2 }
   0x6   : > { %p186_p4 = scmp.lt.s32.totalorder (!%p157_p3), %s440_s12, 1  ;;  %v450_v0 = vmov (!%p157_p3), 0.0   ;;  %vm451_vm0 = vmmov (!%p157_p3), 0   ;;  %v211_v1 = vld [vmem:[%s517_s2] sm:$0xff] (!%p157_p3)  ;;  %v452_v2 = vmov (!%p157_p3), 0   ;;  %v212_v3 = vld [vmem:[%s517_s2 + $0x8] sm:$0xff] (!%p157_p3) }
   0x7   : > { %160 = sbr.rel (%p157_p3) target bundleno = 246 (0xf6), region = 32  ;;  %389 = vmatprep.subr.bf16.mxu0 (!%p157_p3), %v450_v0  ;;  %393 = vmatprep.mubr.msk.bf16.mxu0 (!%p157_p3), %vm451_vm0, %v450_v0  ;;  %v425_v10 = vld [vmem:[%s515_s0] sm:$0xff] (!%p157_p3)   ;;  %vm228_vm1 = vcmask (!%p157_p3), 261120   ;;  %vm281_vm2 = vcmask (!%p157_p3), 519168  }
   0x8   : > { %424 = vset.pattern.permute.xlu0 (!%p157_p3), %v452_v2 }
   0x9   : > { %215 = vperm.xlu0 (!%p157_p3), %424, %v211_v1  }
   0xd   : > { %220 = vperm.xlu0 (!%p157_p3), %424, %v212_v3  }
   0xe   : > { %s524_s12 = smov (!%p186_p4, %s440_s12), 1 }
   0xf   : > { %s382_s18 = sshll.u32 %s524_s12, 5  ;;  %s383_s26 = sshll.u32 %s524_s12, 3 }
  0x10   : > { %s193_s23 = scalar_lea.vmem %s516_s1, %s382_s18  ;;  %s201_s29 = scalar_lea.vmem %s518_s3, %s383_s26 }
  0x11   : > { %v203_v4 = vld [vmem:[%s193_s23] sm:$0xff]  ;;  %v204_v5 = vld [vmem:[%s193_s23 + $0x8] sm:$0xff]  ;;  %v205_v6 = vld [vmem:[%s193_s23 + $0x10] sm:$0xff] }
  0x12   : > { %v207_v7 = vpack.c.bf16 %v204_v5, %v203_v4  ;;  %v206_v8 = vld [vmem:[%s193_s23 + $0x18] sm:$0xff] }
  0x13   : > { %v208_v9 = vpack.c.bf16 %v206_v8, %v205_v6 }
  0x14   : > { %390 = vmatpush3.bf16.msra.mxu0 %v207_v7 }
  0x15   : > { %391 = vmatprep.subr.bf16.mxu0 %v450_v0 }
  0x18   : > { %392 = vmatpush3.bf16.msra.mxu0 %v208_v9 }
  0x1b   : > { %394 = vmatmul.mubr.msk.bf16.vlgmr.msra.gmra.mrb[0].mxu0 %vm228_vm1, %v425_v10 }
  0x88   : > { %v216_v11 = vpop.permute.xlu0 %215 }
  0x8c   : > { %v221_v15 = vpop.permute.xlu0 %220 }
  0xee   : > { %v266_v12 = vpop.f32.mrb[0].mxu0 }
  0xef   : > { %v267_v13 = vadd.f32 %v266_v12, %v216_v11  ;;  %v395_v14 = vpop.f32.mrb[1].mxu0 }
  0xf0   : > { %v269_v16 = vpop.f32.mrb[2].mxu0 }
  0xf1   : > { %v384_v17 = vpack.c.bf16 %v267_v13, %v267_v13  ;;  %v270_v18 = vadd.f32 %v269_v16, %v221_v15  ;;  %v396_v19 = vpop.f32.mrb[3].mxu0 }
  0xf3   : > { %282 = vst.msk [vmem:[%s201_s29] sm:$0xf] %vm281_vm2, %v384_v17  ;;  %v385_v20 = vpack.c.bf16 %v270_v18, %v270_v18 }
  0xf5   : > { %283 = vst.msk [vmem:[%s201_s29 + $0x4] sm:$0xf] %vm281_vm2, %v385_v20 }
  0xf6 PF: > { %s13_s14 = sadd.s32 1, %s448_s14   ;;  %s519_s12 = smov %s444_s13 }
  0xf7   : > { %p10_p5 = scmp.ge.s32.totalorder %s13_s14, 4   ;;  %s520_s13 = smov %s522_s15 }
  0xf9   :  { %12 = sbr.rel (!%p10_p5) target bundleno = 2 (0x2), region = 62 }

</bundles_post_ra>
